<compile_context>
chip_gen: v7x
topology: tpu7x:2x2x1
jax: 0.10.0
libtpu: 0.0.40
codegen_flags: <defaults>
</compile_context>

<pallas_src>
import jax
import jax.numpy as jnp
from jax.experimental import pallas as pl
from jax.experimental.pallas import tpu as pltpu


def _round_up(n, m):
    return ((n + m - 1) // m) * m


# ----------------------------------------------------------------------------
# Pallas kernel
# ----------------------------------------------------------------------------
def _make_ksm_kernel(a_pad, w_pad):
    """Kernel body with the (static) padded widths baked in."""

    def kernel(x_ref, wfc_ref, whead_ref, aux_ref, out_ref):
        # x: (TB, Cin)
        x = x_ref[...]

        # fc (1x1 conv) with inference-BatchNorm folded in:
        #   z = x @ (W_fc^T * bn_scale) + bn_shift
        z = jnp.dot(x, wfc_ref[...], preferred_element_type=jnp.float32)
        z = z + aux_ref[0:1, :a_pad]                      # bn shift (fc bias)

        # StarReLU squared-ReLU part (its affine scale/bias are folded into the
        # fused head weights/bias on the host).
        r = jnp.maximum(z, 0.0)
        r2 = r * r

        # Fused attention heads: one lane-dense matmul + one epilogue.
        # 1/temperature is already folded into whead/bias, so only the
        # per-column post-sigmoid multiplier remains.
        o = jnp.dot(r2, whead_ref[...], preferred_element_type=jnp.float32)
        o = o + aux_ref[1:2, :w_pad]                      # fused head bias
        out_ref[...] = jax.nn.sigmoid(o) * aux_ref[2:3, :w_pad]

    return kernel


# ----------------------------------------------------------------------------
# Wrapper
# ----------------------------------------------------------------------------
def ksm_global_forward(x_nchw, fused, *, in_planes, out_planes, kernel_size,
                       kernel_num):
    """Reshape glue + a single pallas_call over a 1-D batch grid."""
    B, C, H, W = x_nchw.shape
    assert C == in_planes and H == 1 and W == 1, \
        "module forward requires (B, C_in, 1, 1)"

    kk = kernel_size * kernel_size
    a_pad, w_pad, w_max = fused["a_pad"], fused["w_pad"], fused["w_max"]

    x2d = x_nchw.reshape(B, C).astype(jnp.float32)         # (B, Cin)

    # Batch tile: multiple of 8 (f32 sublane); pad B so blocks divide evenly.
    TB = min(128, _round_up(B, 8))
    B_pad = _round_up(B, TB)
    if B_pad != B:
        x2d = jnp.pad(x2d, ((0, B_pad - B), (0, 0)))

    kernel = _make_ksm_kernel(a_pad, w_pad)

    out = pl.pallas_call(
        kernel,
        out_shape=jax.ShapeDtypeStruct((B_pad, w_pad), jnp.float32),
        grid=(B_pad // TB,),
        in_specs=[
            pl.BlockSpec((TB, in_planes), lambda i: (i, 0)),      # streamed x
            pl.BlockSpec((in_planes, a_pad), lambda i: (0, 0)),   # resident W_fc
            pl.BlockSpec((a_pad, w_pad), lambda i: (0, 0)),       # resident W_head
            pl.BlockSpec((3, w_max), lambda i: (0, 0)),           # resident aux
        ],
        out_specs=pl.BlockSpec((TB, w_pad), lambda i: (i, 0)),    # lane-dense out
        compiler_params=pltpu.CompilerParams(
            dimension_semantics=("parallel",)),
    )(x2d, fused["wfc_eff"], fused["whead_eff"], fused["aux"])

    # Slice padding away BEFORE the views so pad lanes never leak out.
    out = out[:B]
    c0 = in_planes
    c1 = c0 + out_planes
    c2 = c1 + kk
    ch = out[:, :c0]
    fl = out[:, c0:c1]
    sp = out[:, c1:c2]
    kn = out[:, c2:c2 + kernel_num]

    channel_attention = ch.reshape(B, 1, 1, in_planes, H, W)
    filter_attention = fl.reshape(B, 1, out_planes, 1, H, W)
    spatial_attention = sp.reshape(B, 1, 1, 1, kernel_size, kernel_size)
    kernel_attention = kn.reshape(B, kernel_num, 1, 1, 1, 1)
    return channel_attention, filter_attention, spatial_attention, kernel_attention


# ----------------------------------------------------------------------------
# Host-side parameter preparation (constant folding, done once)
# ----------------------------------------------------------------------------
def prepare_fused_params(raw, *, in_planes, out_planes, attention_channel,
                         kernel_size, kernel_num, temp, kernel_temp, att_multi):
    A = attention_channel
    kk = kernel_size * kernel_size
    w_tot = in_planes + out_planes + kk + kernel_num
    a_pad = _round_up(A, 128)
    w_pad = _round_up(w_tot, 128)
    w_max = max(a_pad, w_pad)

    # Fold inference BatchNorm: scale into the fc weight, shift as fc bias.
    wfc_eff = raw["wfc_t"] * raw["bn_scale"]                       # (Cin, A)
    bfc = raw["bn_shift"]                                          # (1, A)

    # Concatenate the four heads along the output axis.
    w_head = jnp.concatenate(
        [raw["wch_t"], raw["wfl_t"], raw["wsp_t"], raw["wkn_t"]], axis=1)   # (A, w_tot)
    b_head = jnp.concatenate(
        [raw["bch"], raw["bfl"], raw["bsp"], raw["bkn"]], axis=1)           # (1, w_tot)

    # Fold StarReLU's affine part:  h = s*r^2 + b  =>  h @ W = r^2 @ (s*W) + b*colsum(W)
    # (exact up to f32 summation order; exact with the default s=1, b=0)
    star_s = raw["star_scale"].reshape(())
    star_b = raw["star_bias"].reshape(())
    w_head_eff = star_s * w_head
    b_head_eff = b_head + star_b * jnp.sum(w_head, axis=0, keepdims=True)

    # Fold 1/temperature per output column (temp for ch/fl/sp, kernel_temp for kernel).
    inv_temp = jnp.concatenate([
        jnp.full((1, in_planes + out_planes + kk), 1.0 / temp, jnp.float32),
        jnp.full((1, kernel_num), 1.0 / kernel_temp, jnp.float32)], axis=1)
    w_head_eff = w_head_eff * inv_temp
    b_head_eff = b_head_eff * inv_temp

    # Post-sigmoid multiplier per column (att_multi vs 2/kernel_num).
    mult = jnp.concatenate([
        jnp.full((1, in_planes + out_planes + kk), att_multi, jnp.float32),
        jnp.full((1, kernel_num), 2.0 / kernel_num, jnp.float32)], axis=1)

    # Zero-pad everything to lane-dense widths (multiples of 128).
    wfc_eff = jnp.pad(wfc_eff, ((0, 0), (0, a_pad - A)))
    bfc = jnp.pad(bfc, ((0, 0), (0, a_pad - A)))
    w_head_eff = jnp.pad(w_head_eff, ((0, a_pad - A), (0, w_pad - w_tot)))
    b_head_eff = jnp.pad(b_head_eff, ((0, 0), (0, w_pad - w_tot)))
    mult = jnp.pad(mult, ((0, 0), (0, w_pad - w_tot)))

    # Pack all small vectors into a single (3, w_max) aux array.
    aux = jnp.zeros((3, w_max), jnp.float32)
    aux = aux.at[0, :a_pad].set(bfc[0])
    aux = aux.at[1, :w_pad].set(b_head_eff[0])
    aux = aux.at[2, :w_pad].set(mult[0])

    return {"wfc_eff": wfc_eff, "whead_eff": w_head_eff, "aux": aux,
            "a_pad": a_pad, "w_pad": w_pad, "w_max": w_max}


# ----------------------------------------------------------------------------
# Raw parameter init (mirrors the module's _initialize_weights, eval-mode BN)
# ----------------------------------------------------------------------------
def init_params(key, *, in_planes, out_planes, attention_channel, kernel_size,
                kernel_num, bn_eps=1e-5):
    ks = jax.random.split(key, 6)
    kk = kernel_size * kernel_size

    # fc: Conv2d(in_planes -> A, 1x1, no bias), kaiming_normal fan_out relu
    std_fc = (2.0 / attention_channel) ** 0.5
    wfc = std_fc * jax.random.normal(ks[0], (attention_channel, in_planes), jnp.float32)

    # BatchNorm2d(A): gamma=1, beta=0, running_mean=0, running_var=1 (eval mode)
    gamma = jnp.ones((attention_channel,), jnp.float32)
    beta = jnp.zeros((attention_channel,), jnp.float32)
    running_mean = jnp.zeros((attention_channel,), jnp.float32)
    running_var = jnp.ones((attention_channel,), jnp.float32)
    bn_scale = gamma / jnp.sqrt(running_var + bn_eps)
    bn_shift = beta - running_mean * bn_scale

    # StarReLU: scale=1, bias=0
    star_scale = jnp.ones((1, 1), jnp.float32)
    star_bias = jnp.zeros((1, 1), jnp.float32)

    # channel_fc / spatial_fc / kernel_fc: normal(std=1e-6), bias=0
    wch = 1e-6 * jax.random.normal(ks[1], (in_planes, attention_channel), jnp.float32)
    wsp = 1e-6 * jax.random.normal(ks[2], (kk, attention_channel), jnp.float32)
    wkn = 1e-6 * jax.random.normal(ks[3], (kernel_num, attention_channel), jnp.float32)
    # filter_fc keeps kaiming init (the std=1e-6 override checks func_filter, a method)
    std_fl = (2.0 / out_planes) ** 0.5
    wfl = std_fl * jax.random.normal(ks[4], (out_planes, attention_channel), jnp.float32)

    return {
        "wfc_t": wfc.T,                                  # (Cin, A)
        "bn_scale": bn_scale.reshape(1, -1),             # (1, A)
        "bn_shift": bn_shift.reshape(1, -1),             # (1, A)
        "star_scale": star_scale,                        # (1, 1)
        "star_bias": star_bias,                          # (1, 1)
        "wch_t": wch.T, "bch": jnp.zeros((1, in_planes), jnp.float32),
        "wfl_t": wfl.T, "bfl": jnp.zeros((1, out_planes), jnp.float32),
        "wsp_t": wsp.T, "bsp": jnp.zeros((1, kk), jnp.float32),
        "wkn_t": wkn.T, "bkn": jnp.zeros((1, kernel_num), jnp.float32),
    }


# ----------------------------------------------------------------------------
# Pure-JAX reference (mirrors the PyTorch module, un-fused params)
# ----------------------------------------------------------------------------
def _reference_forward(x_nchw, params, *, in_planes, out_planes, kernel_size,
                       kernel_num, temp=1.0, kernel_temp=1.0, att_multi=2.0):
    B, C, H, W = x_nchw.shape
    x2d = x_nchw.reshape(B, C).astype(jnp.float32)
    h = x2d @ params["wfc_t"]
    h = h * params["bn_scale"] + params["bn_shift"]
    r = jnp.maximum(h, 0.0)
    h = params["star_scale"] * (r * r) + params["star_bias"]
    ch = jax.nn.sigmoid((h @ params["wch_t"] + params["bch"]) / temp) * att_multi
    fl = jax.nn.sigmoid((h @ params["wfl_t"] + params["bfl"]) / temp) * att_multi
    sp = jax.nn.sigmoid((h @ params["wsp_t"] + params["bsp"]) / temp) * att_multi
    kn = jax.nn.sigmoid((h @ params["wkn_t"] + params["bkn"]) / kernel_temp) * (2.0 / kernel_num)
    return (ch.reshape(B, 1, 1, in_planes, H, W),
            fl.reshape(B, 1, out_planes, 1, H, W),
            sp.reshape(B, 1, 1, 1, kernel_size, kernel_size),
            kn.reshape(B, kernel_num, 1, 1, 1, 1))


if __name__ == "__main__":
    # Module config (consistent with the PyTorch __init__ defaults):
    in_planes = 16
    out_planes = 16
    kernel_size = 3
    kernel_num = 4
    reduction = 0.0625
    min_channel = 16
    attention_channel = max(int(in_planes * reduction), min_channel)   # = 16
    temp = 1.0
    kernel_temp = 1.0     # module default is None (would crash); FDConv passes one
    att_multi = 2.0

    key = jax.random.PRNGKey(0)
    kx, kp = jax.random.split(key)

    raw = init_params(kp, in_planes=in_planes, out_planes=out_planes,
                      attention_channel=attention_channel,
                      kernel_size=kernel_size, kernel_num=kernel_num)
    fused = prepare_fused_params(raw, in_planes=in_planes, out_planes=out_planes,
                                 attention_channel=attention_channel,
                                 kernel_size=kernel_size, kernel_num=kernel_num,
                                 temp=temp, kernel_temp=kernel_temp,
                                 att_multi=att_multi)

    # Small demo batch, plus a larger batch that exercises the batch grid +
    # row padding path.
    for B in (2, 300):
        x = jax.random.normal(jax.random.fold_in(kx, B),
                              (B, in_planes, 1, 1), jnp.float32)   # NCHW input
        outs = ksm_global_forward(x, fused, in_planes=in_planes,
                                  out_planes=out_planes,
                                  kernel_size=kernel_size,
                                  kernel_num=kernel_num)
        outs = jax.block_until_ready(outs)

        refs = _reference_forward(x, raw, in_planes=in_planes,
                                  out_planes=out_planes,
                                  kernel_size=kernel_size,
                                  kernel_num=kernel_num,
                                  temp=temp, kernel_temp=kernel_temp,
                                  att_multi=att_multi)
        expected_shapes = [
            (B, 1, 1, in_planes, 1, 1),
            (B, 1, out_planes, 1, 1, 1),
            (B, 1, 1, 1, kernel_size, kernel_size),
            (B, kernel_num, 1, 1, 1, 1),
        ]
        for o, r, s in zip(outs, refs, expected_shapes):
            assert o.shape == s, (o.shape, s)
            assert jnp.allclose(o, r, atol=1e-5, rtol=1e-5), \
                float(jnp.max(jnp.abs(o - r)))

    print("KERNEL_OK")
</pallas_src>

<mosaic_0001>
module attributes {stable_mosaic.version = 11 : i64} {
  func.func @kernel(%arg0: i32, %arg1: memref<8x16xf32, #tpu.memory_space<vmem>>, %arg2: memref<16x128xf32, #tpu.memory_space<vmem>>, %arg3: memref<128x128xf32, #tpu.memory_space<vmem>>, %arg4: memref<3x128xf32, #tpu.memory_space<vmem>>, %arg5: memref<8x128xf32, #tpu.memory_space<vmem>>) attributes {dimension_semantics = [#tpu.dimension_semantics<parallel>], iteration_bounds = array<i64: 1>, scalar_prefetch = 0 : i64, scratch_operands = 0 : i64, tpu.core_type = #tpu.core_type<tc>, window_params = [{transform_indices = @transform_0, window_bounds = array<i64: 8, 16>}, {pipeline_mode = #tpu.pipeline_mode<synchronous>, transform_indices = @transform_1, window_bounds = array<i64: 16, 128>}, {pipeline_mode = #tpu.pipeline_mode<synchronous>, transform_indices = @transform_2, window_bounds = array<i64: 128, 128>}, {pipeline_mode = #tpu.pipeline_mode<synchronous>, transform_indices = @transform_3, window_bounds = array<i64: 3, 128>}, {transform_indices = @transform_4, window_bounds = array<i64: 8, 128>}]} {
    %c0 = arith.constant 0 : index
    %c0_0 = arith.constant 0 : index
    %0 = vector.load %arg1[%c0, %c0_0] : memref<8x16xf32, #tpu.memory_space<vmem>>, vector<8x16xf32>
    %c0_1 = arith.constant 0 : index
    %c0_2 = arith.constant 0 : index
    %1 = vector.load %arg2[%c0_1, %c0_2] : memref<16x128xf32, #tpu.memory_space<vmem>>, vector<16x128xf32>
    %cst = arith.constant dense<0.000000e+00> : vector<8x128xf32>
    %2 = tpu.matmul %0, %1, %cst {dimension_numbers = #tpu.dot_dimension_numbers<[1], [0], [0], [1], [0, 0, 1, 1], [], []>} : vector<8x16xf32>, vector<16x128xf32>, vector<8x128xf32> -> vector<8x128xf32>
    %c0_3 = arith.constant 0 : index
    %c0_4 = arith.constant 0 : index
    %3 = vector.load %arg4[%c0_3, %c0_4] : memref<3x128xf32, #tpu.memory_space<vmem>>, vector<1x128xf32>
    %4 = vector.broadcast %3 : vector<1x128xf32> to vector<8x128xf32>
    %5 = arith.addf %2, %4 : vector<8x128xf32>
    %cst_5 = arith.constant 0.000000e+00 : f32
    %6 = vector.broadcast %cst_5 : f32 to vector<8x128xf32>
    %7 = arith.maximumf %5, %6 : vector<8x128xf32>
    %8 = arith.mulf %7, %7 : vector<8x128xf32>
    %c0_6 = arith.constant 0 : index
    %c0_7 = arith.constant 0 : index
    %9 = vector.load %arg3[%c0_6, %c0_7] : memref<128x128xf32, #tpu.memory_space<vmem>>, vector<128x128xf32>
    %cst_8 = arith.constant dense<0.000000e+00> : vector<8x128xf32>
    %10 = tpu.matmul %8, %9, %cst_8 {dimension_numbers = #tpu.dot_dimension_numbers<[1], [0], [0], [1], [0, 0, 1, 1], [], []>} : vector<8x128xf32>, vector<128x128xf32>, vector<8x128xf32> -> vector<8x128xf32>
    %c1 = arith.constant 1 : index
    %c0_9 = arith.constant 0 : index
    %11 = vector.load %arg4[%c1, %c0_9] : memref<3x128xf32, #tpu.memory_space<vmem>>, vector<1x128xf32>
    %12 = vector.broadcast %11 : vector<1x128xf32> to vector<8x128xf32>
    %13 = arith.addf %10, %12 : vector<8x128xf32>
    %14 = arith.negf %13 : vector<8x128xf32>
    %15 = math.exp %14 : vector<8x128xf32>
    %cst_10 = arith.constant 1.000000e+00 : f32
    %16 = vector.broadcast %cst_10 : f32 to vector<8x128xf32>
    %17 = arith.addf %16, %15 : vector<8x128xf32>
    %18 = arith.divf %16, %17 : vector<8x128xf32>
    %c2 = arith.constant 2 : index
    %c0_11 = arith.constant 0 : index
    %19 = vector.load %arg4[%c2, %c0_11] : memref<3x128xf32, #tpu.memory_space<vmem>>, vector<1x128xf32>
    %20 = vector.broadcast %19 : vector<1x128xf32> to vector<8x128xf32>
    %21 = arith.mulf %18, %20 : vector<8x128xf32>
    %c0_12 = arith.constant 0 : index
    %c0_13 = arith.constant 0 : index
    %22 = vector.load %arg5[%c0_12, %c0_13] : memref<8x128xf32, #tpu.memory_space<vmem>>, vector<8x128xf32>
    tpu.vector_store %arg5[%c0_12, %c0_13], %21 {strides = array<i32>} : memref<8x128xf32, #tpu.memory_space<vmem>>, vector<8x128xf32>,
    return
  }
  func.func @transform_0(%arg0: i32) -> (i32, i32) {
    %c0_i32 = arith.constant 0 : i32
    %c0_i32_0 = arith.constant 0 : i32
    return %arg0, %c0_i32 : i32, i32
  }
  func.func @transform_1(%arg0: i32) -> (i32, i32) {
    %c0_i32 = arith.constant 0 : i32
    %c0_i32_0 = arith.constant 0 : i32
    %c0_i32_1 = arith.constant 0 : i32
    return %c0_i32, %c0_i32_0 : i32, i32
  }
  func.func @transform_2(%arg0: i32) -> (i32, i32) {
    %c0_i32 = arith.constant 0 : i32
    %c0_i32_0 = arith.constant 0 : i32
    %c0_i32_1 = arith.constant 0 : i32
    return %c0_i32, %c0_i32_0 : i32, i32
  }
  func.func @transform_3(%arg0: i32) -> (i32, i32) {
    %c0_i32 = arith.constant 0 : i32
    %c0_i32_0 = arith.constant 0 : i32
    %c0_i32_1 = arith.constant 0 : i32
    return %c0_i32, %c0_i32_0 : i32, i32
  }
  func.func @transform_4(%arg0: i32) -> (i32, i32) {
    %c0_i32 = arith.constant 0 : i32
    %c0_i32_0 = arith.constant 0 : i32
    return %arg0, %c0_i32 : i32, i32
  }
}

</mosaic_0001>

<bundles_post_ra>
// kernel: tpu_custom_call.1
= control target key start
LH: loop header
LB: loop body
LE: loop exit
PB: predicated region body
PF: predicated region fallthrough
CT: control target
= control target key end

     0   :  { %9 = vsyncpa [#allocation3], 0  ;;  %s559_s0 = inlined_call_operand.hbm [shape: f32[8,16], index: 0, kind: input, shape index: {}]   ;;  %s560_s1 = inlined_call_operand.hbm [shape: f32[16,128], index: 1, kind: input, shape index: {}]   ;;  %s561_s2 = inlined_call_operand.hbm [shape: f32[128,128], index: 2, kind: input, shape index: {}]   ;;  %s562_s3 = inlined_call_operand.vmem [shape: f32[3,128], index: 3, kind: input, shape index: {}]   ;;  %s563_s4 = inlined_call_operand.hbm [shape: f32[8,128], index: 4, kind: output, shape index: {}]  }
   0x1   :  { %10 = vsyncpa [#allocation6], 0 }
   0x2   :  { %11 = vsyncpa [#allocation4], 0  ;;  %s462_s15 = smov [#allocation5]   ;;  %s368_s19 = scalar_lea.hbm %s560_s1, 256 }
   0x3   :  { %s27_s16 = sshll.u32 %s462_s15, 4  ;;  %p369_p0 = scmp.ne.s32.totalorder %s560_s1, %s368_s19  ;;  %s28_s16 = int_to_ptr.vmem [resolvable:$true] %s27_s16 }
   0x4   :  { %p372_p1 = scmp.lt.u32.totalorder %s368_s19, %s560_s1 }
   0x6   :  { %p374_p2 = pnand %p372_p1, %p369_p0 }
   0x8   :  { %377 = shalt.err (!%p374_p2)
}
   0x9   :  { %s378_s24 = scalar_lea.vmem %s28_s16, 256  ;;  %p383_p4 = scmp.lt.s32.totalorder %s28_s16, %s28_s16 }
   0xa   :  { %p379_p3 = scmp.ne.s32.totalorder %s28_s16, %s378_s24  ;;  %p384_p5 = scmp.lt.s32.totalorder %s378_s24, %s378_s24 }
   0xc   :  { %p385_p6 = por %p384_p5, %p383_p4 }
   0xe   :  { %p386_p7 = pnand %p385_p6, %p379_p3 }
  0x10   :  { %389 = shalt.err (!%p386_p7)
}
  0x11   :  { %s463_s25 = smov 128   ;;  %s464_s26 = smov 8  }
  0x12   :  { %33 = dma.hbm_to_vmem [thread:$0]  %s560_s1, 256, %s28_s16, [#allocation6], %s463_s25, %s463_s25, %s464_s26  }
  0x13   :  { %s465_s29 = smov [#allocation2]   ;;  %s466_s5 = smov [#allocation7]  }
  0x14   :  { %s18_s30 = sshll.u32 %s465_s29, 4  ;;  %s39_s6 = sshll.u32 %s466_s5, 4  ;;  %s19_s30 = int_to_ptr.vmem [resolvable:$true] %s18_s30  ;;  %s40_s6 = int_to_ptr.vmem [resolvable:$true] %s39_s6 }
  0x15   :  { %s390_s9 = scalar_lea.hbm %s559_s0, 128 }
  0x16   :  { %p391_p8 = scmp.ne.s32.totalorder %s559_s0, %s390_s9  ;;  %p394_p9 = scmp.lt.u32.totalorder %s390_s9, %s559_s0 }
  0x18   :  { %p396_p10 = pnand %p394_p9, %p391_p8 }
  0x1a   :  { %399 = shalt.err (!%p396_p10)
}
  0x1b   :  { %s400_s1 = scalar_lea.vmem %s19_s30, 128  ;;  %p405_p12 = scmp.lt.s32.totalorder %s19_s30, %s19_s30 }
  0x1c   :  { %p401_p11 = scmp.ne.s32.totalorder %s19_s30, %s400_s1  ;;  %p406_p13 = scmp.lt.s32.totalorder %s400_s1, %s400_s1 }
  0x1e   :  { %p407_p0 = por %p406_p13, %p405_p12 }
  0x20   :  { %p408_p1 = pnand %p407_p0, %p401_p11 }
  0x22   :  { %411 = shalt.err (!%p408_p1)
}
  0x23   :  { %21 = dma.hbm_to_vmem [thread:$0]  %s559_s0, 128, %s19_s30, [#allocation3]  }
  0x24   :  { %s412_s18 = scalar_lea.hbm %s561_s2, 2048 }
  0x25   :  { %p413_p2 = scmp.ne.s32.totalorder %s561_s2, %s412_s18  ;;  %p416_p3 = scmp.lt.u32.totalorder %s412_s18, %s561_s2 }
  0x27   :  { %p418_p4 = pnand %p416_p3, %p413_p2 }
  0x29   :  { %421 = shalt.err (!%p418_p4)
}
  0x2a   :  { %s422_s23 = scalar_lea.vmem %s40_s6, 2048  ;;  %p427_p6 = scmp.lt.s32.totalorder %s40_s6, %s40_s6 }
  0x2b   :  { %p423_p5 = scmp.ne.s32.totalorder %s40_s6, %s422_s23  ;;  %p428_p7 = scmp.lt.s32.totalorder %s422_s23, %s422_s23 }
  0x2d   :  { %p429_p8 = por %p428_p7, %p427_p6 }
  0x2f   :  { %p430_p9 = pnand %p429_p8, %p423_p5 }
  0x31   :  { %433 = shalt.err (!%p430_p9)
}
  0x32   :  { %45 = dma.hbm_to_vmem [thread:$0]  %s561_s2, 2048, %s40_s6, [#allocation6], %s463_s25, %s463_s25, %s464_s26  }
  0x33   :  { %456 = dma.done.wait [#allocation3], 128  }
  0x34   :  { %457 = vsyncadd [#allocation3], 4294967168 }
  0x35   :  { %458 = dma.done.wait [#allocation6], 2304  }
  0x36   :  { %459 = vsyncadd [#allocation6], 4294964992  ;;  %v467_v0 = vmov 0.0|0.0   ;;  %vm468_vm0 = vmmov 0   ;;  %v469_v1 = vmov 0.0   ;;  %v58_v2 = vld [vmem:[#allocation5] sm:$0xff] }
  0x37   :  { %328 = vmatprep.subr.bf16.mxu0 %v467_v0  ;;  %290 = vmatprep.mubr.msk.f32.mxu0 %vm468_vm0, %v469_v1  ;;  %v59_v3 = vld [vmem:[#allocation5 + $0x8] sm:$0xff]  ;;  %v141_v5 = vld [vmem:[#allocation7] sm:$0xff]  ;;  %v142_v6 = vld [vmem:[#allocation7 + $0x8] sm:$0xff]  ;;  %vm65_vm1 = vcmask 130048   ;;  %s470_s30 = smov [#allocation8]  }
  0x38   :  { %331 = vmatprep.subr.bf16.mxu1 %v467_v0  ;;  %325 = vmatprep.mubr.msk.f32.mxu1 %vm468_vm0, %v469_v1  ;;  %v329_v4 = vpack.c.bf16 %v59_v3, %v58_v2  ;;  %v143_v7 = vld [vmem:[#allocation7 + $0x10] sm:$0xff]  ;;  %v332_v8 = vpack.c.bf16 %v142_v6, %v141_v5  ;;  %v144_v9 = vld [vmem:[#allocation7 + $0x18] sm:$0xff]  ;;  %v57_v10 = vld [vmem:[#allocation2] sm:$0xff]  ;;  %s251_s5 = sshll.u32 %s470_s30, 4  ;;  %s252_s5 = int_to_ptr.vmem [resolvable:$true] %s251_s5 }
  0x39   :  { %v335_v11 = vpack.c.bf16 %v144_v9, %v143_v7  ;;  %v145_v12 = vld [vmem:[#allocation7 + $0x20] sm:$0xff]  ;;  %v146_v13 = vld [vmem:[#allocation7 + $0x28] sm:$0xff]  ;;  %v147_v15 = vld [vmem:[#allocation7 + $0x30] sm:$0xff]  ;;  %s434_s6 = scalar_lea.vmem %s252_s5, 128  ;;  %p439_p11 = scmp.lt.s32.totalorder %s252_s5, %s252_s5 }
  0x3a   :  { %330 = vmatpush3.bf16.msra.mxu0 %v329_v4  ;;  %333 = vmatpush3.bf16.msra.mxu1 %v332_v8  ;;  %v338_v14 = vpack.c.bf16 %v146_v13, %v145_v12  ;;  %v148_v16 = vld [vmem:[#allocation7 + $0x38] sm:$0xff]  ;;  %v149_v18 = vld [vmem:[#allocation7 + $0x40] sm:$0xff]  ;;  %v150_v19 = vld [vmem:[#allocation7 + $0x48] sm:$0xff]  ;;  %p435_p10 = scmp.ne.s32.totalorder %s252_s5, %s434_s6  ;;  %p440_p12 = scmp.lt.s32.totalorder %s434_s6, %s434_s6 }
  0x3b   :  { %334 = vmatprep.subr.bf16.mxu1 %v467_v0  ;;  %v341_v17 = vpack.c.bf16 %v148_v16, %v147_v15  ;;  %v344_v20 = vpack.c.bf16 %v150_v19, %v149_v18  ;;  %v151_v21 = vld [vmem:[#allocation7 + $0x50] sm:$0xff]  ;;  %v152_v22 = vld [vmem:[#allocation7 + $0x58] sm:$0xff]  ;;  %v153_v24 = vld [vmem:[#allocation7 + $0x60] sm:$0xff] }
  0x3c   :  { %v347_v23 = vpack.c.bf16 %v152_v22, %v151_v21  ;;  %v154_v25 = vld [vmem:[#allocation7 + $0x68] sm:$0xff]  ;;  %v155_v27 = vld [vmem:[#allocation7 + $0x70] sm:$0xff]  ;;  %v156_v28 = vld [vmem:[#allocation7 + $0x78] sm:$0xff]  ;;  %p441_p13 = por %p440_p12, %p439_p11 }
  0x3d   :  { %291 = vmatmul.mubr.msk.f32.vlgmr.msra.gmra.mrb[0].mxu0 %vm65_vm1, %v57_v10  ;;  %v350_v26 = vpack.c.bf16 %v154_v25, %v153_v24  ;;  %v353_v29 = vpack.c.bf16 %v156_v28, %v155_v27  ;;  %v261_v30 = vld [vmem:[%s562_s3] ss:$0 sm:$0xff]  ;;  %v263_v36 = vld [vmem:[%s562_s3 + $0x1] ss:$0 sm:$0xff]  ;;  %v265_v43 = vld [vmem:[%s562_s3 + $0x2] ss:$0 sm:$0xff] }
  0x3e   :  { %336 = vmatpush3.bf16.msra.mxu1 %v335_v11  ;;  %p442_p0 = pnand %p441_p13, %p435_p10 }
  0x3f   :  { %337 = vmatprep.subr.bf16.mxu1 %v467_v0 }
  0x42   :  { %339 = vmatpush3.bf16.msra.mxu1 %v338_v14 }
  0x43   :  { %340 = vmatprep.subr.bf16.mxu1 %v467_v0 }
  0x46   :  { %342 = vmatpush3.bf16.msra.mxu1 %v341_v17 }
  0x47   :  { %343 = vmatprep.subr.bf16.mxu1 %v467_v0 }
  0x4a   :  { %345 = vmatpush3.bf16.msra.mxu1 %v344_v20 }
  0x4b   :  { %346 = vmatprep.subr.bf16.mxu1 %v467_v0 }
  0x4e   :  { %348 = vmatpush3.bf16.msra.mxu1 %v347_v23 }
  0x4f   :  { %349 = vmatprep.subr.bf16.mxu1 %v467_v0 }
  0x52   :  { %351 = vmatpush3.bf16.msra.mxu1 %v350_v26 }
  0x53   :  { %352 = vmatprep.subr.bf16.mxu1 %v467_v0 }
  0x56   :  { %354 = vmatpush3.bf16.msra.mxu1 %v353_v29 }
 0x110   :  { %v135_v31 = vpop.f32.mrb[0].mxu0 }
 0x111   :  { %v136_v32 = vadd.f32 %v261_v30, %v135_v31  ;;  %v292_v33 = vpop.f32.mrb[1].mxu0 }
 0x113   :  { %v139_v34 = vmax.f32 %v136_v32, 0.0 }
 0x115   :  { %v140_v35 = vmul.f32 %v139_v34, %v139_v34 }
 0x117   :  { %326 = vmatmul.mubr.f32.vlgmr.msra.gmra.mrb[0].mxu1 %v140_v35 }
 0x1ea   :  { %v228_v37 = vpop.f32.mrb[0].mxu1 }
 0x1eb   :  { %v229_v38 = vadd.f32 %v263_v36, %v228_v37  ;;  %v327_v39 = vpop.f32.mrb[1].mxu1 }
 0x1ed   :  { %v264_v40 = vmul.f32 -1.442695, %v229_v38 }
 0x1ef   :  { %364 = vpow2.f32 %v264_v40 }
 0x1f9   :  { %v365_v41 = vpop.eup %364 }
 0x1fa   :  { %v235_v42 = vadd.f32 1.0, %v365_v41 }
 0x1fc   :  { %366 = vrcp.f32 %v235_v42 }
 0x206   :  { %v367_v44 = vpop.eup %366 }
 0x207   :  { %v243_v45 = vmul.f32 %v367_v44, %v265_v43 }
 0x209   :  { %244 = vst [vmem:[#allocation8] sm:$0xff] %v243_v45 }
 0x20a   :  { %445 = shalt.err (!%p442_p0)
}
 0x20b   :  { %s446_s9 = scalar_lea.hbm %s563_s4, 128 }
 0x20c   :  { %p447_p1 = scmp.ne.s32.totalorder %s563_s4, %s446_s9  ;;  %p450_p2 = scmp.lt.u32.totalorder %s446_s9, %s563_s4 }
 0x20e   :  { %p452_p3 = pnand %p450_p2, %p447_p1 }
 0x210   :  { %455 = shalt.err (!%p452_p3)
}
 0x211   :  { %254 = dma.vmem_to_hbm [thread:$0]  %s252_s5, 128, %s563_s4, [#allocation4]  }
 0x212   :  { %460 = dma.done.wait [#allocation4], 128  }
 0x213   :  { %461 = vsyncadd [#allocation4], 4294967168 }
 0x214   :  { %258 = vsyncpa [#allocation3], 1 }
 0x215   :  { %259 = vsyncpa [#allocation6], 1 }
 0x216   :  { %260 = vsyncpa [#allocation4], 1 }

</bundles_post_ra>
